<compile_context>
chip_gen: v7x
topology: tpu7x:2x2x1
jax: 0.10.0
libtpu: 0.0.40
codegen_flags: <defaults>
</compile_context>

<pallas_src>
import jax
import jax.numpy as jnp
from jax.experimental import pallas as pl
from jax.experimental.pallas import tpu as pltpu


def _round_up(x, m):
    return ((x + m - 1) // m) * m


# ---------------------------------------------------------------------------
# Fused forward kernel (one batch tile per grid step)
# ---------------------------------------------------------------------------
def hero_interaction_kernel(
    x_ref,                    # (2*TB, Hin_p): rows [0,TB) radiant, [TB,2TB) dire (this tile)
    wt_ref, bt_ref,           # fc_team                     (Hin_p, H_p), (1, H_p)
    wsc_ref, bs_ref, bc_ref,  # fused fc_synergy|fc_counter (H_p, 2*H_p), (1, H_p), (1, H_p)
    wcomb_ref, bcomb_ref,     # fc_combined (stacked)       (2*H_p, H_p), (1, H_p)
    wf_ref, bf_ref,           # fc_final                    (1, H_p) row, (1, 1)
    out_ref,                  # (TB, 1) f32
):
    f32 = jnp.float32
    TB = out_ref.shape[0]
    Hp = bt_ref.shape[1]

    x = x_ref[...]

    # fc_team + relu: radiant and dire share one MXU push (stacked on sublanes).
    # NOTE: zero-padded batch rows compute relu(bias) != 0.  Harmless because every
    # layer is row-independent and padded rows are sliced off host-side — do NOT add
    # cross-row ops (e.g. batch norm) without revisiting this.
    hidden = jnp.maximum(
        jnp.dot(x, wt_ref[...], preferred_element_type=f32) + bt_ref[...], 0.0)

    # Fused fc_synergy | fc_counter: one (H_p, 2*H_p) weight, one MXU push on the
    # stacked hidden (serialized matmul chain: 5 -> 4).
    y = jnp.dot(hidden.astype(wsc_ref.dtype), wsc_ref[...],
                preferred_element_type=f32)                       # (2TB, 2*Hp)

    synergy = jnp.maximum(y[:, 0:Hp] + bs_ref[...], 0.0)          # stacked (2TB, Hp)
    rs = synergy[0:TB, :]
    ds = synergy[TB:2 * TB, :]

    # (rh - dh) @ Wc == rh@Wc - dh@Wc (distributivity); dire branch is a VPU negate.
    s = y[0:TB, Hp:2 * Hp] - y[TB:2 * TB, Hp:2 * Hp]
    bc = bc_ref[...]
    r_counter = jnp.maximum(s + bc, 0.0)
    d_counter = jnp.maximum(-s + bc, 0.0)

    # fc_combined: lane-concat [r_feat | d_feat] (TB, 2*H_p) against the pre-stacked
    # weight -> one K=2*H_p matmul (accumulation stays inside the MXU).
    # Dropout(p=0.5) is identity in eval mode.
    feat = jnp.concatenate([rs + r_counter, ds + d_counter],
                           axis=1).astype(wcomb_ref.dtype)
    combined = jnp.maximum(
        jnp.dot(feat, wcomb_ref[...], preferred_element_type=f32) + bcomb_ref[...],
        0.0)

    # fc_final + sigmoid: (H_p, 1) matmul replaced by VPU multiply + lane reduction.
    wf_row = wf_ref[...].astype(f32)                              # (1, H_p)
    logits = jnp.sum(combined * wf_row, axis=-1, keepdims=True) + bf_ref[...]
    out_ref[...] = jax.nn.sigmoid(logits).astype(out_ref.dtype)
    # TODO(synk): for very large serving batches emit a lane-dense (1, TB) output
    # (batch along lanes) instead of this (TB, 1) column; HBM writeback is already
    # contiguous here, only the in-VMEM vst.msk would be saved.


# ---------------------------------------------------------------------------
# One-time parameter preparation (hoisted out of the per-call path)
# ---------------------------------------------------------------------------
def prepare_params(params, compute_dtype=jnp.bfloat16):
    """Pads / fuses / casts the weights once. `compute_dtype` is the MXU operand
    dtype (bf16 default for v5e/v6e/v7x peak; pass f32 for strict numerics).
    Biases are always f32; accumulation inside the kernel is always f32."""
    n_heroes, H = params["w_team"].shape
    Hin_p = _round_up(n_heroes, 128)   # 124 -> 128
    H_p = _round_up(H, 128)            # 256 -> 256
    cd = compute_dtype
    f32 = jnp.float32

    def pad_w(w, rows, cols, r0=0, c0=0):
        out = jnp.zeros((rows, cols), cd)
        return out.at[r0:r0 + w.shape[0], c0:c0 + w.shape[1]].set(w.astype(cd))

    def pad_b(b, cols):
        return jnp.zeros((1, cols), f32).at[:, :b.shape[1]].set(b.astype(f32))

    wt = pad_w(params["w_team"], Hin_p, H_p)
    bt = pad_b(params["b_team"], H_p)

    # Fused synergy|counter weight: synergy cols at [0, H), counter cols at [H_p, H_p+H).
    wsc = jnp.zeros((H_p, 2 * H_p), cd)
    wsc = wsc.at[:H, :H].set(params["w_synergy"].astype(cd))
    wsc = wsc.at[:H, H_p:H_p + H].set(params["w_counter"].astype(cd))
    bs = pad_b(params["b_synergy"], H_p)
    bc = pad_b(params["b_counter"], H_p)

    # fc_combined stacked for the in-kernel lane concat: radiant half at rows [0, H),
    # dire half at rows [H_p, H_p+H).
    wcomb = jnp.zeros((2 * H_p, H_p), cd)
    wcomb = wcomb.at[:H, :H].set(params["w_combined"][:H, :].astype(cd))
    wcomb = wcomb.at[H_p:H_p + H, :H].set(params["w_combined"][H:, :].astype(cd))
    bcomb = pad_b(params["b_combined"], H_p)

    wf = pad_b(params["w_final"].T, H_p)                 # (1, H_p) f32 row vector
    bf = params["b_final"].astype(f32).reshape(1, 1)     # (1, 1)

    return dict(wt=wt, bt=bt, wsc=wsc, bs=bs, bc=bc,
                wcomb=wcomb, bcomb=bcomb, wf=wf, bf=bf)


# ---------------------------------------------------------------------------
# Jitted forward (input staging fuses with the pallas_call)
# ---------------------------------------------------------------------------
@jax.jit
def hero_interaction_forward(radiant_input, dire_input, prepared):
    B, n_heroes = radiant_input.shape
    wt = prepared["wt"]
    Hin_p, H_p = wt.shape
    cd = wt.dtype
    f32 = jnp.float32

    # Batch tile: multiple of 8 sublanes, capped so live intermediates stay well
    # inside v7x's 64 MiB VMEM (re-derived vs. v5e/v6e's 128 MiB).
    TILE_B = min(_round_up(B, 8), 256)
    Bp = _round_up(B, TILE_B)
    G = Bp // TILE_B

    # Per-tile self-contained team layout: within each TILE_B block, radiant rows
    # then dire rows, so every grid step can split teams with sublane slices.
    rad = jnp.zeros((Bp, Hin_p), cd).at[:B, :n_heroes].set(radiant_input.astype(cd))
    dr = jnp.zeros((Bp, Hin_p), cd).at[:B, :n_heroes].set(dire_input.astype(cd))
    x = jnp.concatenate(
        [rad.reshape(G, TILE_B, Hin_p), dr.reshape(G, TILE_B, Hin_p)],
        axis=1).reshape(G * 2 * TILE_B, Hin_p)

    args = (x, prepared["wt"], prepared["bt"], prepared["wsc"], prepared["bs"],
            prepared["bc"], prepared["wcomb"], prepared["bcomb"],
            prepared["wf"], prepared["bf"])

    # Weights/biases: full-array blocks with constant index_maps -> resident in VMEM,
    # DMA'd once across the whole grid.  Activations are tiled along the batch grid.
    def resident(a):
        return pl.BlockSpec(a.shape, lambda i: (0,) * a.ndim)

    in_specs = ([pl.BlockSpec((2 * TILE_B, Hin_p), lambda i: (i, 0))]
                + [resident(a) for a in args[1:]])
    out_specs = pl.BlockSpec((TILE_B, 1), lambda i: (i, 0))

    # Advisory cost estimate so XLA schedules around this small custom call.
    flops = (2 * (2 * Bp) * Hin_p * H_p            # fc_team (stacked)
             + 2 * (2 * Bp) * H_p * (2 * H_p)      # fused synergy|counter
             + 2 * Bp * (2 * H_p) * H_p            # fc_combined
             + 2 * Bp * H_p)                       # fc_final
    bytes_accessed = sum(int(a.size) * jnp.dtype(a.dtype).itemsize for a in args)
    bytes_accessed += Bp * 4
    cost = pl.CostEstimate(flops=int(flops), transcendentals=int(Bp),
                           bytes_accessed=int(bytes_accessed))

    out = pl.pallas_call(
        hero_interaction_kernel,
        out_shape=jax.ShapeDtypeStruct((Bp, 1), f32),
        grid=(G,),
        in_specs=in_specs,
        out_specs=out_specs,
        compiler_params=pltpu.CompilerParams(dimension_semantics=("parallel",)),
        cost_estimate=cost,
    )(*args)
    return out[:B]


# ---------------------------------------------------------------------------
# Synthetic params + pure-JAX reference (matches the PyTorch module, eval mode)
# ---------------------------------------------------------------------------
def init_params(key, num_heroes, hidden_dim):
    """Deterministic synthetic parameters (weights stored as (in, out))."""
    ks = jax.random.split(key, 10)

    def lin(kw, kb, fan_in, fan_out):
        bound = 1.0 / jnp.sqrt(fan_in)
        w = jax.random.uniform(kw, (fan_in, fan_out), jnp.float32, -bound, bound)
        b = jax.random.uniform(kb, (1, fan_out), jnp.float32, -bound, bound)
        return w, b

    p = {}
    p["w_team"], p["b_team"] = lin(ks[0], ks[1], num_heroes, hidden_dim)
    p["w_synergy"], p["b_synergy"] = lin(ks[2], ks[3], hidden_dim, hidden_dim)
    p["w_counter"], p["b_counter"] = lin(ks[4], ks[5], hidden_dim, hidden_dim)
    p["w_combined"], p["b_combined"] = lin(ks[6], ks[7], 2 * hidden_dim, hidden_dim)
    p["w_final"], p["b_final"] = lin(ks[8], ks[9], hidden_dim, 1)
    return p


def reference_forward(radiant_input, dire_input, p):
    relu = lambda x: jnp.maximum(x, 0.0)
    rh = relu(radiant_input @ p["w_team"] + p["b_team"])
    dh = relu(dire_input @ p["w_team"] + p["b_team"])
    rs = relu(rh @ p["w_synergy"] + p["b_synergy"])
    ds = relu(dh @ p["w_synergy"] + p["b_synergy"])
    rc = relu((rh - dh) @ p["w_counter"] + p["b_counter"])
    dc = relu((dh - rh) @ p["w_counter"] + p["b_counter"])
    combined = jnp.concatenate([rs + rc, ds + dc], axis=1)
    combined = relu(combined @ p["w_combined"] + p["b_combined"])
    return jax.nn.sigmoid(combined @ p["w_final"] + p["b_final"])


if __name__ == "__main__":
    NUM_HEROES = 124   # HEROES_IN_DOTA
    HIDDEN_DIM = 256   # hidden_dim from the module spec
    BATCH = 2

    key = jax.random.PRNGKey(0)
    k_rad, k_dire, k_params = jax.random.split(key, 3)

    # multi-hot style hero picks (values in {0, 1})
    radiant_input = (jax.random.uniform(k_rad, (BATCH, NUM_HEROES)) < 0.04).astype(jnp.float32)
    dire_input = (jax.random.uniform(k_dire, (BATCH, NUM_HEROES)) < 0.04).astype(jnp.float32)

    params = init_params(k_params, NUM_HEROES, HIDDEN_DIM)
    ref = reference_forward(radiant_input, dire_input, params)

    # f32-operand path.  Tolerance is set to cover (a) the fused-counter distributivity
    # restructure ((rh-dh)@Wc vs rh@Wc-dh@Wc) and (b) f32-matmul decomposition
    # differences between Pallas/Mosaic and XLA across TPU generations (review note).
    prep_f32 = prepare_params(params, compute_dtype=jnp.float32)
    out = hero_interaction_forward(radiant_input, dire_input, prep_f32)
    out = jax.block_until_ready(out)
    assert out.shape == (BATCH, 1)
    assert jnp.allclose(out, ref, atol=2e-3, rtol=2e-3), (out, ref)

    # Default serving path: persistent bf16 weights / bf16 MXU operands, f32 accumulate.
    prep_bf16 = prepare_params(params)   # bf16 default
    out_bf16 = hero_interaction_forward(radiant_input, dire_input, prep_bf16)
    out_bf16 = jax.block_until_ready(out_bf16)
    assert out_bf16.shape == (BATCH, 1)
    assert jnp.allclose(out_bf16, ref, atol=5e-2), (out_bf16, ref)

    print("KERNEL_OK")
</pallas_src>

<mosaic_0001>
module attributes {stable_mosaic.version = 11 : i64} {
  func.func @hero_interaction_kernel(%arg0: i32, %arg1: memref<16x128xf32, #tpu.memory_space<vmem>>, %arg2: memref<128x256xf32, #tpu.memory_space<vmem>>, %arg3: memref<1x256xf32, #tpu.memory_space<vmem>>, %arg4: memref<256x512xf32, #tpu.memory_space<vmem>>, %arg5: memref<1x256xf32, #tpu.memory_space<vmem>>, %arg6: memref<1x256xf32, #tpu.memory_space<vmem>>, %arg7: memref<512x256xf32, #tpu.memory_space<vmem>>, %arg8: memref<1x256xf32, #tpu.memory_space<vmem>>, %arg9: memref<1x256xf32, #tpu.memory_space<vmem>>, %arg10: memref<1x1xf32, #tpu.memory_space<vmem>>, %arg11: memref<8x1xf32, #tpu.memory_space<vmem>>) attributes {dimension_semantics = [#tpu.dimension_semantics<parallel>], iteration_bounds = array<i64: 1>, scalar_prefetch = 0 : i64, scratch_operands = 0 : i64, tpu.core_type = #tpu.core_type<tc>, window_params = [{transform_indices = @transform_0, window_bounds = array<i64: 16, 128>}, {pipeline_mode = #tpu.pipeline_mode<synchronous>, transform_indices = @transform_1, window_bounds = array<i64: 128, 256>}, {pipeline_mode = #tpu.pipeline_mode<synchronous>, transform_indices = @transform_2, window_bounds = array<i64: 1, 256>}, {pipeline_mode = #tpu.pipeline_mode<synchronous>, transform_indices = @transform_3, window_bounds = array<i64: 256, 512>}, {pipeline_mode = #tpu.pipeline_mode<synchronous>, transform_indices = @transform_4, window_bounds = array<i64: 1, 256>}, {pipeline_mode = #tpu.pipeline_mode<synchronous>, transform_indices = @transform_5, window_bounds = array<i64: 1, 256>}, {pipeline_mode = #tpu.pipeline_mode<synchronous>, transform_indices = @transform_6, window_bounds = array<i64: 512, 256>}, {pipeline_mode = #tpu.pipeline_mode<synchronous>, transform_indices = @transform_7, window_bounds = array<i64: 1, 256>}, {pipeline_mode = #tpu.pipeline_mode<synchronous>, transform_indices = @transform_8, window_bounds = array<i64: 1, 256>}, {pipeline_mode = #tpu.pipeline_mode<synchronous>, transform_indices = @transform_9, window_bounds = array<i64: 1, 1>}, {transform_indices = @transform_10, window_bounds = array<i64: 8, 1>}]} {
    %c0 = arith.constant 0 : index
    %c0_0 = arith.constant 0 : index
    %0 = vector.load %arg1[%c0, %c0_0] : memref<16x128xf32, #tpu.memory_space<vmem>>, vector<16x128xf32>
    %c0_1 = arith.constant 0 : index
    %c0_2 = arith.constant 0 : index
    %1 = vector.load %arg2[%c0_1, %c0_2] : memref<128x256xf32, #tpu.memory_space<vmem>>, vector<128x256xf32>
    %cst = arith.constant dense<0.000000e+00> : vector<16x256xf32>
    %2 = tpu.matmul %0, %1, %cst {dimension_numbers = #tpu.dot_dimension_numbers<[1], [0], [0], [1], [0, 0, 1, 1], [], []>} : vector<16x128xf32>, vector<128x256xf32>, vector<16x256xf32> -> vector<16x256xf32>
    %c0_3 = arith.constant 0 : index
    %c0_4 = arith.constant 0 : index
    %3 = vector.load %arg3[%c0_3, %c0_4] : memref<1x256xf32, #tpu.memory_space<vmem>>, vector<1x256xf32>
    %4 = vector.broadcast %3 : vector<1x256xf32> to vector<16x256xf32>
    %5 = arith.addf %2, %4 : vector<16x256xf32>
    %cst_5 = arith.constant 0.000000e+00 : f32
    %6 = vector.broadcast %cst_5 : f32 to vector<16x256xf32>
    %7 = arith.maximumf %5, %6 : vector<16x256xf32>
    %c0_6 = arith.constant 0 : index
    %c0_7 = arith.constant 0 : index
    %8 = vector.load %arg4[%c0_6, %c0_7] : memref<256x512xf32, #tpu.memory_space<vmem>>, vector<256x512xf32>
    %cst_8 = arith.constant dense<0.000000e+00> : vector<16x512xf32>
    %9 = tpu.matmul %7, %8, %cst_8 {dimension_numbers = #tpu.dot_dimension_numbers<[1], [0], [0], [1], [0, 0, 1, 1], [], []>} : vector<16x256xf32>, vector<256x512xf32>, vector<16x512xf32> -> vector<16x512xf32>
    %10 = vector.extract_strided_slice %9 {offsets = [0, 0], sizes = [16, 256], strides = [1, 1]} : vector<16x512xf32> to vector<16x256xf32>
    %c0_9 = arith.constant 0 : index
    %c0_10 = arith.constant 0 : index
    %11 = vector.load %arg5[%c0_9, %c0_10] : memref<1x256xf32, #tpu.memory_space<vmem>>, vector<1x256xf32>
    %12 = vector.broadcast %11 : vector<1x256xf32> to vector<16x256xf32>
    %13 = arith.addf %10, %12 : vector<16x256xf32>
    %cst_11 = arith.constant 0.000000e+00 : f32
    %14 = vector.broadcast %cst_11 : f32 to vector<16x256xf32>
    %15 = arith.maximumf %13, %14 : vector<16x256xf32>
    %16 = vector.extract_strided_slice %15 {offsets = [0, 0], sizes = [8, 256], strides = [1, 1]} : vector<16x256xf32> to vector<8x256xf32>
    %17 = vector.extract_strided_slice %15 {offsets = [8, 0], sizes = [8, 256], strides = [1, 1]} : vector<16x256xf32> to vector<8x256xf32>
    %18 = vector.extract_strided_slice %9 {offsets = [0, 256], sizes = [8, 256], strides = [1, 1]} : vector<16x512xf32> to vector<8x256xf32>
    %19 = vector.extract_strided_slice %9 {offsets = [8, 256], sizes = [8, 256], strides = [1, 1]} : vector<16x512xf32> to vector<8x256xf32>
    %20 = arith.subf %18, %19 : vector<8x256xf32>
    %c0_12 = arith.constant 0 : index
    %c0_13 = arith.constant 0 : index
    %21 = vector.load %arg6[%c0_12, %c0_13] : memref<1x256xf32, #tpu.memory_space<vmem>>, vector<1x256xf32>
    %22 = vector.broadcast %21 : vector<1x256xf32> to vector<8x256xf32>
    %23 = arith.addf %20, %22 : vector<8x256xf32>
    %cst_14 = arith.constant 0.000000e+00 : f32
    %24 = vector.broadcast %cst_14 : f32 to vector<8x256xf32>
    %25 = arith.maximumf %23, %24 : vector<8x256xf32>
    %cst_15 = arith.constant 0.000000e+00 : f32
    %26 = vector.broadcast %cst_15 : f32 to vector<8x256xf32>
    %27 = arith.subf %26, %20 : vector<8x256xf32>
    %28 = vector.broadcast %21 : vector<1x256xf32> to vector<8x256xf32>
    %29 = arith.addf %27, %28 : vector<8x256xf32>
    %cst_16 = arith.constant 0.000000e+00 : f32
    %30 = vector.broadcast %cst_16 : f32 to vector<8x256xf32>
    %31 = arith.maximumf %29, %30 : vector<8x256xf32>
    %32 = arith.addf %16, %25 : vector<8x256xf32>
    %33 = arith.addf %17, %31 : vector<8x256xf32>
    %34 = tpu.concatenate %32, %33 in 1 : vector<8x256xf32>, vector<8x256xf32> -> vector<8x512xf32>
    %c0_17 = arith.constant 0 : index
    %c0_18 = arith.constant 0 : index
    %35 = vector.load %arg7[%c0_17, %c0_18] : memref<512x256xf32, #tpu.memory_space<vmem>>, vector<512x256xf32>
    %cst_19 = arith.constant dense<0.000000e+00> : vector<8x256xf32>
    %36 = tpu.matmul %34, %35, %cst_19 {dimension_numbers = #tpu.dot_dimension_numbers<[1], [0], [0], [1], [0, 0, 1, 1], [], []>} : vector<8x512xf32>, vector<512x256xf32>, vector<8x256xf32> -> vector<8x256xf32>
    %c0_20 = arith.constant 0 : index
    %c0_21 = arith.constant 0 : index
    %37 = vector.load %arg8[%c0_20, %c0_21] : memref<1x256xf32, #tpu.memory_space<vmem>>, vector<1x256xf32>
    %38 = vector.broadcast %37 : vector<1x256xf32> to vector<8x256xf32>
    %39 = arith.addf %36, %38 : vector<8x256xf32>
    %cst_22 = arith.constant 0.000000e+00 : f32
    %40 = vector.broadcast %cst_22 : f32 to vector<8x256xf32>
    %41 = arith.maximumf %39, %40 : vector<8x256xf32>
    %c0_23 = arith.constant 0 : index
    %c0_24 = arith.constant 0 : index
    %42 = vector.load %arg9[%c0_23, %c0_24] : memref<1x256xf32, #tpu.memory_space<vmem>>, vector<1x256xf32>
    %43 = vector.broadcast %42 : vector<1x256xf32> to vector<8x256xf32>
    %44 = arith.mulf %41, %43 : vector<8x256xf32>
    %cst_25 = arith.constant dense<0.000000e+00> : vector<8xf32>
    %45 = vector.multi_reduction <add>, %44, %cst_25 [1] : vector<8x256xf32> to vector<8xf32>
    %46 = vector.shape_cast %45 : vector<8xf32> to vector<8x1xf32>
    %c0_26 = arith.constant 0 : index
    %c0_27 = arith.constant 0 : index
    %47 = vector.load %arg10[%c0_26, %c0_27] : memref<1x1xf32, #tpu.memory_space<vmem>>, vector<1x1xf32>
    %48 = vector.broadcast %47 : vector<1x1xf32> to vector<8x1xf32>
    %49 = arith.addf %46, %48 : vector<8x1xf32>
    %50 = arith.negf %49 : vector<8x1xf32>
    %51 = math.exp %50 : vector<8x1xf32>
    %cst_28 = arith.constant 1.000000e+00 : f32
    %52 = vector.broadcast %cst_28 : f32 to vector<8x1xf32>
    %53 = arith.addf %52, %51 : vector<8x1xf32>
    %54 = arith.divf %52, %53 : vector<8x1xf32>
    %c0_29 = arith.constant 0 : index
    %c0_30 = arith.constant 0 : index
    %55 = vector.load %arg11[%c0_29, %c0_30] : memref<8x1xf32, #tpu.memory_space<vmem>>, vector<8x1xf32>
    tpu.vector_store %arg11[%c0_29, %c0_30], %54 {strides = array<i32>} : memref<8x1xf32, #tpu.memory_space<vmem>>, vector<8x1xf32>,
    return
  }
  func.func @transform_0(%arg0: i32) -> (i32, i32) {
    %c0_i32 = arith.constant 0 : i32
    %c0_i32_0 = arith.constant 0 : i32
    return %arg0, %c0_i32 : i32, i32
  }
  func.func @transform_1(%arg0: i32) -> (i32, i32) {
    %c0_i32 = arith.constant 0 : i32
    %c0_i32_0 = arith.constant 0 : i32
    %c0_i32_1 = arith.constant 0 : i32
    return %c0_i32, %c0_i32_0 : i32, i32
  }
  func.func @transform_2(%arg0: i32) -> (i32, i32) {
    %c0_i32 = arith.constant 0 : i32
    %c0_i32_0 = arith.constant 0 : i32
    %c0_i32_1 = arith.constant 0 : i32
    return %c0_i32, %c0_i32_0 : i32, i32
  }
  func.func @transform_3(%arg0: i32) -> (i32, i32) {
    %c0_i32 = arith.constant 0 : i32
    %c0_i32_0 = arith.constant 0 : i32
    %c0_i32_1 = arith.constant 0 : i32
    return %c0_i32, %c0_i32_0 : i32, i32
  }
  func.func @transform_4(%arg0: i32) -> (i32, i32) {
    %c0_i32 = arith.constant 0 : i32
    %c0_i32_0 = arith.constant 0 : i32
    %c0_i32_1 = arith.constant 0 : i32
    return %c0_i32, %c0_i32_0 : i32, i32
  }
  func.func @transform_5(%arg0: i32) -> (i32, i32) {
    %c0_i32 = arith.constant 0 : i32
    %c0_i32_0 = arith.constant 0 : i32
    %c0_i32_1 = arith.constant 0 : i32
    return %c0_i32, %c0_i32_0 : i32, i32
  }
  func.func @transform_6(%arg0: i32) -> (i32, i32) {
    %c0_i32 = arith.constant 0 : i32
    %c0_i32_0 = arith.constant 0 : i32
    %c0_i32_1 = arith.constant 0 : i32
    return %c0_i32, %c0_i32_0 : i32, i32
  }
  func.func @transform_7(%arg0: i32) -> (i32, i32) {
    %c0_i32 = arith.constant 0 : i32
    %c0_i32_0 = arith.constant 0 : i32
    %c0_i32_1 = arith.constant 0 : i32
    return %c0_i32, %c0_i32_0 : i32, i32
  }
  func.func @transform_8(%arg0: i32) -> (i32, i32) {
    %c0_i32 = arith.constant 0 : i32
    %c0_i32_0 = arith.constant 0 : i32
    %c0_i32_1 = arith.constant 0 : i32
    return %c0_i32, %c0_i32_0 : i32, i32
  }
  func.func @transform_9(%arg0: i32) -> (i32, i32) {
    %c0_i32 = arith.constant 0 : i32
    %c0_i32_0 = arith.constant 0 : i32
    %c0_i32_1 = arith.constant 0 : i32
    return %c0_i32, %c0_i32_0 : i32, i32
  }
  func.func @transform_10(%arg0: i32) -> (i32, i32) {
    %c0_i32 = arith.constant 0 : i32
    %c0_i32_0 = arith.constant 0 : i32
    return %arg0, %c0_i32 : i32, i32
  }
}

</mosaic_0001>

<bundles_post_ra>
// kernel: hero_interaction_forward.1
= control target key start
LH: loop header
LB: loop body
LE: loop exit
PB: predicated region body
PF: predicated region fallthrough
CT: control target
= control target key end

     0   :  { %s1376_s0 = inlined_call_operand.vmem [shape: f32[16,128], index: 0, kind: input, shape index: {}]   ;;  %s1377_s1 = inlined_call_operand.hbm [shape: f32[128,256], index: 1, kind: input, shape index: {}]   ;;  %s1378_s2 = inlined_call_operand.vmem [shape: f32[1,256], index: 2, kind: input, shape index: {}]   ;;  %s1379_s3 = inlined_call_operand.hbm [shape: f32[256,512], index: 3, kind: input, shape index: {}]   ;;  %s1380_s4 = inlined_call_operand.vmem [shape: f32[1,256], index: 4, kind: input, shape index: {}]   ;;  %s1381_s5 = inlined_call_operand.vmem [shape: f32[1,256], index: 5, kind: input, shape index: {}]   ;;  %s1382_s6 = inlined_call_operand.hbm [shape: f32[512,256], index: 6, kind: input, shape index: {}]   ;;  %s1383_s7 = inlined_call_operand.vmem [shape: f32[1,256], index: 7, kind: input, shape index: {}]   ;;  %s1384_s8 = inlined_call_operand.vmem [shape: f32[1,256], index: 8, kind: input, shape index: {}]   ;;  %s1385_s9 = inlined_call_operand.<no memory space> [shape: f32[1,1], index: 9, kind: input, shape index: {}]   ;;  %s1386_s10 = inlined_call_operand.vmem [shape: f32[8,1], index: 10, kind: output, shape index: {}]  }
   0x1   :  { %v15_v0 = vstv %s1385_s9 }
   0x2   :  { %16 = vst [vmem:[#allocation2] sm:$0x1] %v15_v0 }
   0x3   :  { %17 = vsyncpa [#allocation4], 0 }
   0x4   :  { %18 = vsyncpa [#allocation6], 0  ;;  %s1234_s15 = smov [#allocation5]   ;;  %s1164_s19 = scalar_lea.hbm %s1379_s3, 16384 }
   0x5   :  { %s40_s16 = sshll.u32 %s1234_s15, 4  ;;  %p1165_p0 = scmp.ne.s32.totalorder %s1379_s3, %s1164_s19  ;;  %s41_s16 = int_to_ptr.vmem [resolvable:$true] %s40_s16 }
   0x6   :  { %p1168_p1 = scmp.lt.u32.totalorder %s1164_s19, %s1379_s3 }
   0x8   :  { %p1170_p2 = pnand %p1168_p1, %p1165_p0 }
   0xa   :  { %1173 = shalt.err (!%p1170_p2)
}
   0xb   :  { %s1174_s9 = scalar_lea.vmem %s41_s16, 16384  ;;  %p1179_p4 = scmp.lt.s32.totalorder %s41_s16, %s41_s16 }
   0xc   :  { %p1175_p3 = scmp.ne.s32.totalorder %s41_s16, %s1174_s9  ;;  %p1180_p5 = scmp.lt.s32.totalorder %s1174_s9, %s1174_s9 }
   0xe   :  { %p1181_p6 = por %p1180_p5, %p1179_p4 }
  0x10   :  { %p1182_p7 = pnand %p1181_p6, %p1175_p3 }
  0x12   :  { %1185 = shalt.err (!%p1182_p7)
}
  0x13   :  { %s1235_s24 = smov 512   ;;  %s1236_s25 = smov 32  }
  0x14   :  { %46 = dma.hbm_to_vmem [thread:$0]  %s1379_s3, 16384, %s41_s16, [#allocation6], %s1235_s24, %s1235_s24, %s1236_s25  }
  0x15   :  { %s1237_s28 = smov [#allocation3]   ;;  %s1186_s12 = scalar_lea.hbm %s1377_s1, 4096 }
  0x16   :  { %s26_s29 = sshll.u32 %s1237_s28, 4  ;;  %p1187_p8 = scmp.ne.s32.totalorder %s1377_s1, %s1186_s12  ;;  %s27_s29 = int_to_ptr.vmem [resolvable:$true] %s26_s29 }
  0x17   :  { %p1190_p9 = scmp.lt.u32.totalorder %s1186_s12, %s1377_s1 }
  0x19   :  { %p1192_p10 = pnand %p1190_p9, %p1187_p8 }
  0x1b   :  { %1195 = shalt.err (!%p1192_p10)
}
  0x1c   :  { %s1196_s18 = scalar_lea.vmem %s27_s29, 4096  ;;  %p1201_p12 = scmp.lt.s32.totalorder %s27_s29, %s27_s29 }
  0x1d   :  { %p1197_p11 = scmp.ne.s32.totalorder %s27_s29, %s1196_s18  ;;  %p1202_p13 = scmp.lt.s32.totalorder %s1196_s18, %s1196_s18 }
  0x1f   :  { %p1203_p0 = por %p1202_p13, %p1201_p12 }
  0x21   :  { %p1204_p1 = pnand %p1203_p0, %p1197_p11 }
  0x23   :  { %1207 = shalt.err (!%p1204_p1)
}
  0x24   :  { %s1238_s3 = smov 256   ;;  %s1239_s16 = smov 16  }
  0x25   :  { %32 = dma.hbm_to_vmem [thread:$0]  %s1377_s1, 4096, %s27_s29, [#allocation4], %s1238_s3, %s1238_s3, %s1239_s16  }
  0x26   :  { %s1240_s21 = smov [#allocation7]   ;;  %s1208_s24 = scalar_lea.hbm %s1382_s6, 16384 }
  0x27   :  { %s56_s22 = sshll.u32 %s1240_s21, 4  ;;  %p1209_p2 = scmp.ne.s32.totalorder %s1382_s6, %s1208_s24  ;;  %s57_s22 = int_to_ptr.vmem [resolvable:$true] %s56_s22 }
  0x28   :  { %p1212_p3 = scmp.lt.u32.totalorder %s1208_s24, %s1382_s6 }
  0x2a   :  { %p1214_p4 = pnand %p1212_p3, %p1209_p2 }
  0x2c   :  { %1217 = shalt.err (!%p1214_p4)
}
  0x2d   :  { %s1218_s30 = scalar_lea.vmem %s57_s22, 16384  ;;  %p1223_p6 = scmp.lt.s32.totalorder %s57_s22, %s57_s22 }
  0x2e   :  { %p1219_p5 = scmp.ne.s32.totalorder %s57_s22, %s1218_s30  ;;  %p1224_p7 = scmp.lt.s32.totalorder %s1218_s30, %s1218_s30 }
  0x30   :  { %p1225_p8 = por %p1224_p7, %p1223_p6 }
  0x32   :  { %p1226_p9 = pnand %p1225_p8, %p1219_p5 }
  0x34   :  { %1229 = shalt.err (!%p1226_p9)
}
  0x35   :  { %62 = dma.hbm_to_vmem [thread:$0]  %s1382_s6, 16384, %s57_s22, [#allocation6], %s1238_s3, %s1238_s3, %s1239_s16  }
  0x36   :  { %1230 = dma.done.wait [#allocation4], 4096  }
  0x37   :  { %1231 = vsyncadd [#allocation4], 4294963200 }
  0x38   :  { %1232 = dma.done.wait [#allocation6], 32768  }
  0x39   :  { %1233 = vsyncadd [#allocation6], 4294934528  ;;  %v1241_v1 = vmov 0.0   ;;  %v81_v2 = vld [vmem:[#allocation3 + $0x8] sm:$0xff]  ;;  %v83_v3 = vld [vmem:[#allocation3 + $0x18] sm:$0xff]  ;;  %vm850_vm0 = vcmask 7168  }
  0x3a   :  { %188 = vmatprep.mubr.f32.mxu0 %v1241_v1  ;;  %v80_v4 = vld [vmem:[#allocation3] sm:$0xff]  ;;  %v860_v5 = vpack.c.bf16 %v83_v3, %v81_v2  ;;  %v82_v6 = vld [vmem:[#allocation3 + $0x10] sm:$0xff]  ;;  %v85_v7 = vld [vmem:[#allocation3 + $0x28] sm:$0xff] }
  0x3b   :  { %v87_v8 = vld [vmem:[#allocation3 + $0x38] sm:$0xff]  ;;  %v862_v9 = vpack.c.bf16 %v82_v6, %v80_v4  ;;  %v84_v11 = vld [vmem:[#allocation3 + $0x20] sm:$0xff]  ;;  %v86_v12 = vld [vmem:[#allocation3 + $0x30] sm:$0xff] }
  0x3c   :  { %v864_v10 = vpack.c.bf16 %v87_v8, %v85_v7  ;;  %v89_v13 = vld [vmem:[#allocation3 + $0x48] sm:$0xff]  ;;  %861 = vmatprep.subr.bf16.mxu0 %v860_v5  ;;  %v91_v14 = vld [vmem:[#allocation3 + $0x58] sm:$0xff]  ;;  %v866_v15 = vpack.c.bf16 %v86_v12, %v84_v11  ;;  %v88_v17 = vld [vmem:[#allocation3 + $0x40] sm:$0xff] }
  0x3d   :  { %863 = vmatpush1.bf16.msra.mxu0 %v862_v9  ;;  %v868_v16 = vpack.c.bf16 %v91_v14, %v89_v13  ;;  %v90_v18 = vld [vmem:[#allocation3 + $0x50] sm:$0xff]  ;;  %v93_v19 = vld [vmem:[#allocation3 + $0x68] sm:$0xff]  ;;  %v95_v20 = vld [vmem:[#allocation3 + $0x78] sm:$0xff] }
  0x3e   :  { %865 = vmatprep.subr.bf16.mxu0 %v864_v10  ;;  %v870_v21 = vpack.c.bf16 %v90_v18, %v88_v17  ;;  %v872_v22 = vpack.c.bf16 %v95_v20, %v93_v19  ;;  %v92_v23 = vld [vmem:[#allocation3 + $0x60] sm:$0xff]  ;;  %v94_v24 = vld [vmem:[#allocation3 + $0x70] sm:$0xff]  ;;  %v97_v25 = vld [vmem:[#allocation3 + $0x88] sm:$0xff] }
  0x3f   :  { %v99_v26 = vld [vmem:[#allocation3 + $0x98] sm:$0xff]  ;;  %v206_v27 = vld [vmem:[#allocation5 + $0x8] sm:$0xff]  ;;  %v874_v29 = vpack.c.bf16 %v94_v24, %v92_v23  ;;  %v96_v30 = vld [vmem:[#allocation3 + $0x80] sm:$0xff] }
  0x40   :  { %v210_v28 = vld [vmem:[#allocation5 + $0x28] sm:$0xff]  ;;  %v205_v32 = vld [vmem:[#allocation5] sm:$0xff]  ;;  %v876_v33 = vpack.c.bf16 %v99_v26, %v97_v25  ;;  %v98_v34 = vld [vmem:[#allocation3 + $0x90] sm:$0xff] }
  0x41   :  { %867 = vmatpush1.bf16.msra.mxu0 %v866_v15  ;;  %v892_v31 = vpack.c.bf16 %v210_v28, %v206_v27  ;;  %v101_v35 = vld [vmem:[#allocation3 + $0xa8] sm:$0xff]  ;;  %v209_v36 = vld [vmem:[#allocation5 + $0x20] sm:$0xff]  ;;  %v103_v37 = vld [vmem:[#allocation3 + $0xb8] sm:$0xff]  ;;  %v878_v44 = vpack.c.bf16 %v98_v34, %v96_v30 }
  0x42   :  { %869 = vmatprep.subr.bf16.mxu0 %v868_v16  ;;  %v894_v38 = vpack.c.bf16 %v209_v36, %v205_v32  ;;  %v214_v39 = vld [vmem:[#allocation5 + $0x48] sm:$0xff]  ;;  %v213_v42 = vld [vmem:[#allocation5 + $0x40] sm:$0xff]  ;;  %v880_v48 = vpack.c.bf16 %v103_v37, %v101_v35  ;;  %v102_v49 = vld [vmem:[#allocation3 + $0xb0] sm:$0xff] }
  0x43   :  { %893 = vmatprep.subr.bf16.mxu1 %v892_v31  ;;  %v218_v40 = vld [vmem:[#allocation5 + $0x68] sm:$0xff]  ;;  %v217_v43 = vld [vmem:[#allocation5 + $0x60] sm:$0xff]  ;;  %v107_v52 = vld [vmem:[#allocation3 + $0xd8] sm:$0xff] }
  0x44   :  { %v896_v41 = vpack.c.bf16 %v218_v40, %v214_v39  ;;  %v100_v45 = vld [vmem:[#allocation3 + $0xa0] sm:$0xff]  ;;  %895 = vmatpush1.bf16.msra.mxu1 %v894_v38  ;;  %v898_v46 = vpack.c.bf16 %v217_v43, %v213_v42  ;;  %v222_v47 = vld [vmem:[#allocation5 + $0x88] sm:$0xff]  ;;  %v106_v60 = vld [vmem:[#allocation3 + $0xd0] sm:$0xff] }
  0x45   :  { %871 = vmatpush1.bf16.msra.mxu0 %v870_v21  ;;  %v105_v50 = vld [vmem:[#allocation3 + $0xc8] sm:$0xff]  ;;  %v221_v54 = vld [vmem:[#allocation5 + $0x80] sm:$0xff]  ;;  %v882_v58 = vpack.c.bf16 %v102_v49, %v100_v45  ;;  %v111_v4 = vld [vmem:[#allocation3 + $0xf8] sm:$0xff] }
  0x46   :  { %873 = vmatprep.subr.bf16.mxu0 %v872_v22  ;;  %897 = vmatprep.subr.bf16.mxu1 %v896_v41  ;;  %v226_v51 = vld [vmem:[#allocation5 + $0xa8] sm:$0xff]  ;;  %v225_v55 = vld [vmem:[#allocation5 + $0xa0] sm:$0xff]  ;;  %v884_v62 = vpack.c.bf16 %v107_v52, %v105_v50  ;;  %v110_v9 = vld [vmem:[#allocation3 + $0xf0] sm:$0xff] }
  0x47   :  { %v900_v53 = vpack.c.bf16 %v226_v51, %v222_v47  ;;  %v230_v56 = vld [vmem:[#allocation5 + $0xc8] sm:$0xff]  ;;  %v104_v59 = vld [vmem:[#allocation3 + $0xc0] sm:$0xff]  ;;  %v902_v61 = vpack.c.bf16 %v225_v55, %v221_v54  ;;  %v208_v12 = vld [vmem:[#allocation5 + $0x18] sm:$0xff] }
  0x48   :  { %v234_v57 = vld [vmem:[#allocation5 + $0xe8] sm:$0xff]  ;;  %899 = vmatpush1.bf16.msra.mxu1 %v898_v46  ;;  %v229_v2 = vld [vmem:[#allocation5 + $0xc0] sm:$0xff]  ;;  %v886_v7 = vpack.c.bf16 %v106_v60, %v104_v59  ;;  %v212_v16 = vld [vmem:[#allocation5 + $0x38] sm:$0xff] }
  0x49   :  { %875 = vmatpush1.bf16.msra.mxu0 %v874_v29  ;;  %v109_v63 = vld [vmem:[#allocation3 + $0xe8] sm:$0xff]  ;;  %901 = vmatprep.subr.bf16.mxu1 %v900_v53  ;;  %v904_v0 = vpack.c.bf16 %v234_v57, %v230_v56  ;;  %v233_v3 = vld [vmem:[#allocation5 + $0xe0] sm:$0xff]  ;;  %v956_v21 = vpack.c.bf16 %v212_v16, %v208_v12  ;;  %v207_v22 = vld [vmem:[#allocation5 + $0x10] sm:$0xff] }
  0x4a   :  { %877 = vmatprep.subr.bf16.mxu0 %v876_v33  ;;  %v238_v5 = vld [vmem:[#allocation5 + $0x108] sm:$0xff]  ;;  %v108_v8 = vld [vmem:[#allocation3 + $0xe0] sm:$0xff]  ;;  %v906_v10 = vpack.c.bf16 %v233_v3, %v229_v2  ;;  %v888_v11 = vpack.c.bf16 %v111_v4, %v109_v63  ;;  %v211_v23 = vld [vmem:[#allocation5 + $0x30] sm:$0xff] }
  0x4b   :  { %v242_v6 = vld [vmem:[#allocation5 + $0x128] sm:$0xff]  ;;  %v237_v14 = vld [vmem:[#allocation5 + $0x100] sm:$0xff]  ;;  %v890_v19 = vpack.c.bf16 %v110_v9, %v108_v8  ;;  %v216_v24 = vld [vmem:[#allocation5 + $0x58] sm:$0xff]  ;;  %v958_v32 = vpack.c.bf16 %v211_v23, %v207_v22 }
  0x4c   :  { %903 = vmatpush1.bf16.msra.mxu1 %v902_v61  ;;  %v908_v13 = vpack.c.bf16 %v242_v6, %v238_v5  ;;  %v241_v15 = vld [vmem:[#allocation5 + $0x120] sm:$0xff]  ;;  %v246_v17 = vld [vmem:[#allocation5 + $0x148] sm:$0xff]  ;;  %v220_v26 = vld [vmem:[#allocation5 + $0x78] sm:$0xff] }
  0x4d   :  { %879 = vmatpush1.bf16.msra.mxu0 %v878_v44  ;;  %905 = vmatprep.subr.bf16.mxu1 %v904_v0  ;;  %v250_v18 = vld [vmem:[#allocation5 + $0x168] sm:$0xff]  ;;  %v910_v20 = vpack.c.bf16 %v241_v15, %v237_v14  ;;  %v245_v27 = vld [vmem:[#allocation5 + $0x140] sm:$0xff]  ;;  %v960_v33 = vpack.c.bf16 %v220_v26, %v216_v24  ;;  %v215_v34 = vld [vmem:[#allocation5 + $0x50] sm:$0xff] }
  0x4e   :  { %881 = vmatprep.subr.bf16.mxu0 %v880_v48  ;;  %v912_v25 = vpack.c.bf16 %v250_v18, %v246_v17  ;;  %v249_v28 = vld [vmem:[#allocation5 + $0x160] sm:$0xff]  ;;  %v254_v29 = vld [vmem:[#allocation5 + $0x188] sm:$0xff]  ;;  %v219_v35 = vld [vmem:[#allocation5 + $0x70] sm:$0xff] }
  0x4f   :  { %v258_v30 = vld [vmem:[#allocation5 + $0x1a8] sm:$0xff]  ;;  %v78_v31 = vld [vmem:[%s1376_s0] sm:$0xff]  ;;  %v914_v37 = vpack.c.bf16 %v249_v28, %v245_v27  ;;  %v962_v45 = vpack.c.bf16 %v219_v35, %v215_v34  ;;  %v223_v47 = vld [vmem:[#allocation5 + $0x90] sm:$0xff] }
  0x50   :  { %907 = vmatpush1.bf16.msra.mxu1 %v906_v10  ;;  %v224_v36 = vld [vmem:[#allocation5 + $0x98] sm:$0xff]  ;;  %v916_v39 = vpack.c.bf16 %v258_v30, %v254_v29  ;;  %v253_v40 = vld [vmem:[#allocation5 + $0x180] sm:$0xff]  ;;  %v262_v42 = vld [vmem:[#allocation5 + $0x1c8] sm:$0xff] }
  0x51   :  { %883 = vmatpush1.bf16.msra.mxu0 %v882_v58  ;;  %909 = vmatprep.subr.bf16.mxu1 %v908_v13  ;;  %v228_v38 = vld [vmem:[#allocation5 + $0xb8] sm:$0xff]  ;;  %v257_v41 = vld [vmem:[#allocation5 + $0x1a0] sm:$0xff]  ;;  %v266_v43 = vld [vmem:[#allocation5 + $0x1e8] sm:$0xff] }
  0x52   :  { %885 = vmatprep.subr.bf16.mxu0 %v884_v62  ;;  %v79_v44 = vld [vmem:[%s1376_s0 + $0x8] sm:$0xff]  ;;  %v964_v46 = vpack.c.bf16 %v228_v38, %v224_v36  ;;  %v227_v48 = vld [vmem:[#allocation5 + $0xb0] sm:$0xff]  ;;  %v232_v49 = vld [vmem:[#allocation5 + $0xd8] sm:$0xff]  ;;  %v918_v50 = vpack.c.bf16 %v257_v41, %v253_v40  ;;  %v920_v52 = vpack.c.bf16 %v266_v43, %v262_v42 }
  0x53   :  { %v236_v51 = vld [vmem:[#allocation5 + $0xf8] sm:$0xff]  ;;  %v261_v53 = vld [vmem:[#allocation5 + $0x1c0] sm:$0xff]  ;;  %v274_v55 = vld [vmem:[#allocation5 + $0x228] sm:$0xff]  ;;  %v966_v56 = vpack.c.bf16 %v227_v48, %v223_v47 }
  0x54   :  { %911 = vmatpush1.bf16.msra.mxu1 %v910_v20  ;;  %v265_v54 = vld [vmem:[#allocation5 + $0x1e0] sm:$0xff]  ;;  %v968_v57 = vpack.c.bf16 %v236_v51, %v232_v49  ;;  %v231_v58 = vld [vmem:[#allocation5 + $0xd0] sm:$0xff]  ;;  %v240_v60 = vld [vmem:[#allocation5 + $0x118] sm:$0xff] }
  0x55   :  { %887 = vmatpush1.bf16.msra.mxu0 %v886_v7  ;;  %913 = vmatprep.subr.bf16.mxu1 %v912_v25  ;;  %v235_v59 = vld [vmem:[#allocation5 + $0xf0] sm:$0xff]  ;;  %v922_v61 = vpack.c.bf16 %v265_v54, %v261_v53  ;;  %v244_v62 = vld [vmem:[#allocation5 + $0x138] sm:$0xff]  ;;  %v269_v0 = vld [vmem:[#allocation5 + $0x200] sm:$0xff] }
  0x56   :  { %889 = vmatprep.subr.bf16.mxu0 %v888_v11  ;;  %v273_v2 = vld [vmem:[#allocation5 + $0x220] sm:$0xff]  ;;  %v278_v3 = vld [vmem:[#allocation5 + $0x248] sm:$0xff]  ;;  %v970_v5 = vpack.c.bf16 %v235_v59, %v231_v58  ;;  %v972_v6 = vpack.c.bf16 %v244_v62, %v240_v60  ;;  %v239_v7 = vld [vmem:[#allocation5 + $0x110] sm:$0xff] }
  0x57   :  { %v282_v4 = vld [vmem:[#allocation5 + $0x268] sm:$0xff]  ;;  %v243_v8 = vld [vmem:[#allocation5 + $0x130] sm:$0xff]  ;;  %v248_v9 = vld [vmem:[#allocation5 + $0x158] sm:$0xff]  ;;  %v926_v10 = vpack.c.bf16 %v273_v2, %v269_v0 }
  0x58   :  { %915 = vmatpush1.bf16.msra.mxu1 %v914_v37  ;;  %v252_v11 = vld [vmem:[#allocation5 + $0x178] sm:$0xff]  ;;  %v928_v12 = vpack.c.bf16 %v282_v4, %v278_v3  ;;  %v277_v13 = vld [vmem:[#allocation5 + $0x240] sm:$0xff]  ;;  %v286_v15 = vld [vmem:[#allocation5 + $0x288] sm:$0xff]  ;;  %v974_v17 = vpack.c.bf16 %v243_v8, %v239_v7 }
  0x59   :  { %891 = vmatpush1.bf16.msra.mxu0 %v890_v19  ;;  %917 = vmatprep.subr.bf16.mxu1 %v916_v39  ;;  %v281_v14 = vld [vmem:[#allocation5 + $0x260] sm:$0xff]  ;;  %v290_v16 = vld [vmem:[#allocation5 + $0x2a8] sm:$0xff]  ;;  %v976_v18 = vpack.c.bf16 %v252_v11, %v248_v9  ;;  %v247_v19 = vld [vmem:[#allocation5 + $0x150] sm:$0xff] }
  0x5a   :  { %957 = vmatprep.subr.bf16.mxu0 %v956_v21  ;;  %v251_v20 = vld [vmem:[#allocation5 + $0x170] sm:$0xff]  ;;  %v256_v21 = vld [vmem:[#allocation5 + $0x198] sm:$0xff]  ;;  %v930_v22 = vpack.c.bf16 %v281_v14, %v277_v13  ;;  %v932_v24 = vpack.c.bf16 %v290_v16, %v286_v15  ;;  %v285_v25 = vld [vmem:[#allocation5 + $0x280] sm:$0xff] }
  0x5b   :  { %v260_v23 = vld [vmem:[#allocation5 + $0x1b8] sm:$0xff]  ;;  %v289_v26 = vld [vmem:[#allocation5 + $0x2a0] sm:$0xff]  ;;  %v294_v27 = vld [vmem:[#allocation5 + $0x2c8] sm:$0xff]  ;;  %v978_v29 = vpack.c.bf16 %v251_v20, %v247_v19 }
  0x5c   :  { %189 = vmatmul.mubr.f32.vlgmr.msra.gmra.mrb[0].mxu0 %v78_v31  ;;  %919 = vmatpush1.bf16.msra.mxu1 %v918_v50  ;;  %v298_v28 = vld [vmem:[#allocation5 + $0x2e8] sm:$0xff]  ;;  %v980_v30 = vpack.c.bf16 %v260_v23, %v256_v21  ;;  %v255_v31 = vld [vmem:[#allocation5 + $0x190] sm:$0xff]  ;;  %v934_v34 = vpack.c.bf16 %v289_v26, %v285_v25  ;;  %v268_v35 = vld [vmem:[#allocation5 + $0x1f8] sm:$0xff] }
  0x5d   :  { %194 = vmatprep.mubr.f32.mxu0 %v1241_v1  ;;  %959 = vmatpush1.bf16.msra.mxu0 %v958_v32  ;;  %v270_v1 = vld [vmem:[#allocation5 + $0x208] sm:$0xff]  ;;  %v259_v32 = vld [vmem:[#allocation5 + $0x1b0] sm:$0xff]  ;;  %v936_v36 = vpack.c.bf16 %v298_v28, %v294_v27  ;;  %v293_v37 = vld [vmem:[#allocation5 + $0x2c0] sm:$0xff] }
  0x5e   :  { %961 = vmatprep.subr.bf16.mxu0 %v960_v33  ;;  %921 = vmatprep.subr.bf16.mxu1 %v920_v52  ;;  %v924_v63 = vpack.c.bf16 %v274_v55, %v270_v1  ;;  %v264_v33 = vld [vmem:[#allocation5 + $0x1d8] sm:$0xff]  ;;  %v297_v38 = vld [vmem:[#allocation5 + $0x2e0] sm:$0xff]  ;;  %v302_v39 = vld [vmem:[#allocation5 + $0x308] sm:$0xff]  ;;  %v982_v41 = vpack.c.bf16 %v259_v32, %v255_v31 }
  0x5f   :  { %v306_v40 = vld [vmem:[#allocation5 + $0x328] sm:$0xff]  ;;  %v984_v42 = vpack.c.bf16 %v268_v35, %v264_v33  ;;  %v263_v43 = vld [vmem:[#allocation5 + $0x1d0] sm:$0xff]  ;;  %v276_v47 = vld [vmem:[#allocation5 + $0x238] sm:$0xff] }
  0x60   :  { %195 = vmatmul.mubr.f32.gmra.mrb[2].mxu0 %v79_v44  ;;  %923 = vmatpush1.bf16.msra.mxu1 %v922_v61  ;;  %v267_v44 = vld [vmem:[#allocation5 + $0x1f0] sm:$0xff]  ;;  %v940_v48 = vpack.c.bf16 %v306_v40, %v302_v39  ;;  %v301_v49 = vld [vmem:[#allocation5 + $0x300] sm:$0xff]  ;;  %v310_v51 = vld [vmem:[#allocation5 + $0x348] sm:$0xff] }
  0x61   :  { %963 = vmatpush1.bf16.msra.mxu0 %v962_v45  ;;  %925 = vmatprep.subr.bf16.mxu1 %v924_v63  ;;  %v272_v45 = vld [vmem:[#allocation5 + $0x218] sm:$0xff]  ;;  %v305_v50 = vld [vmem:[#allocation5 + $0x320] sm:$0xff]  ;;  %v314_v52 = vld [vmem:[#allocation5 + $0x368] sm:$0xff]  ;;  %v986_v53 = vpack.c.bf16 %v267_v44, %v263_v43 }
  0x62   :  { %965 = vmatprep.subr.bf16.mxu0 %v964_v46  ;;  %v938_v46 = vpack.c.bf16 %v297_v38, %v293_v37  ;;  %v988_v54 = vpack.c.bf16 %v276_v47, %v272_v45  ;;  %v271_v1 = vld [vmem:[#allocation5 + $0x210] sm:$0xff]  ;;  %v284_v58 = vld [vmem:[#allocation5 + $0x278] sm:$0xff]  ;;  %v944_v59 = vpack.c.bf16 %v314_v52, %v310_v51  ;;  %v309_v60 = vld [vmem:[#allocation5 + $0x340] sm:$0xff] }
  0x63   :  { %v275_v55 = vld [vmem:[#allocation5 + $0x230] sm:$0xff]  ;;  %v313_v61 = vld [vmem:[#allocation5 + $0x360] sm:$0xff]  ;;  %v318_v62 = vld [vmem:[#allocation5 + $0x388] sm:$0xff] }
  0x64   :  { %927 = vmatpush1.bf16.msra.mxu1 %v926_v10  ;;  %v322_v63 = vld [vmem:[#allocation5 + $0x3a8] sm:$0xff]  ;;  %v990_v0 = vpack.c.bf16 %v275_v55, %v271_v1  ;;  %v279_v3 = vld [vmem:[#allocation5 + $0x250] sm:$0xff]  ;;  %v292_v7 = vld [vmem:[#allocation5 + $0x2b8] sm:$0xff] }
  0x65   :  { %967 = vmatpush1.bf16.msra.mxu0 %v966_v56  ;;  %929 = vmatprep.subr.bf16.mxu1 %v928_v12  ;;  %v280_v56 = vld [vmem:[#allocation5 + $0x258] sm:$0xff]  ;;  %v283_v4 = vld [vmem:[#allocation5 + $0x270] sm:$0xff]  ;;  %v948_v8 = vpack.c.bf16 %v322_v63, %v318_v62  ;;  %v317_v35 = vld [vmem:[#allocation5 + $0x380] sm:$0xff] }
  0x66   :  { %969 = vmatprep.subr.bf16.mxu0 %v968_v57  ;;  %v942_v57 = vpack.c.bf16 %v305_v50, %v301_v49  ;;  %v992_v2 = vpack.c.bf16 %v284_v58, %v280_v56  ;;  %v994_v9 = vpack.c.bf16 %v283_v4, %v279_v3  ;;  %v287_v11 = vld [vmem:[#allocation5 + $0x290] sm:$0xff]  ;;  %v296_v13 = vld [vmem:[#allocation5 + $0x2d8] sm:$0xff]  ;;  %v329_v47 = vld [vmem:[#allocation5 + $0x3e0] sm:$0xff]  ;;  %v114_v58 = vlaneseq }
  0x67   :  { %v291_v12 = vld [vmem:[#allocation5 + $0x2b0] sm:$0xff]  ;;  %v300_v14 = vld [vmem:[#allocation5 + $0x2f8] sm:$0xff]  ;;  %v600_v55 = vld [vmem:[#allocation7 + $0x208] sm:$0xff] }
  0x68   :  { %931 = vmatpush1.bf16.msra.mxu1 %v930_v22  ;;  %v998_v15 = vpack.c.bf16 %v291_v12, %v287_v11  ;;  %v1000_v16 = vpack.c.bf16 %v300_v14, %v296_v13  ;;  %v304_v19 = vld [vmem:[#allocation5 + $0x318] sm:$0xff]  ;;  %v303_v23 = vld [vmem:[#allocation5 + $0x310] sm:$0xff]  ;;  %v535_v3 = vld [vmem:[#allocation7] sm:$0xff] }
  0x69   :  { %971 = vmatpush1.bf16.msra.mxu0 %v970_v5  ;;  %933 = vmatprep.subr.bf16.mxu1 %v932_v24  ;;  %v946_v5 = vpack.c.bf16 %v313_v61, %v309_v60  ;;  %v308_v20 = vld [vmem:[#allocation5 + $0x338] sm:$0xff]  ;;  %v307_v24 = vld [vmem:[#allocation5 + $0x330] sm:$0xff]  ;;  %v604_v12 = vld [vmem:[#allocation7 + $0x228] sm:$0xff] }
  0x6a   :  { %973 = vmatprep.subr.bf16.mxu0 %v972_v6  ;;  %v288_v6 = vld [vmem:[#allocation5 + $0x298] sm:$0xff]  ;;  %v1004_v22 = vpack.c.bf16 %v308_v20, %v304_v19  ;;  %v1006_v27 = vpack.c.bf16 %v307_v24, %v303_v23  ;;  %v319_v37 = vld [vmem:[#allocation5 + $0x390] sm:$0xff] }
  0x6b   :  { %v996_v10 = vpack.c.bf16 %v292_v7, %v288_v6  ;;  %v312_v25 = vld [vmem:[#allocation5 + $0x358] sm:$0xff]  ;;  %v323_v39 = vld [vmem:[#allocation5 + $0x3b0] sm:$0xff]  ;;  %v599_v7 = vld [vmem:[#allocation7 + $0x200] sm:$0xff] }
  0x6c   :  { %935 = vmatpush1.bf16.msra.mxu1 %v934_v34  ;;  %v316_v26 = vld [vmem:[#allocation5 + $0x378] sm:$0xff]  ;;  %v1014_v40 = vpack.c.bf16 %v323_v39, %v319_v37  ;;  %v327_v50 = vld [vmem:[#allocation5 + $0x3d0] sm:$0xff] }
  0x6d   :  { %975 = vmatpush1.bf16.msra.mxu0 %v974_v17  ;;  %937 = vmatprep.subr.bf16.mxu1 %v936_v36  ;;  %v295_v17 = vld [vmem:[#allocation5 + $0x2d0] sm:$0xff]  ;;  %v1008_v28 = vpack.c.bf16 %v316_v26, %v312_v25  ;;  %v320_v31 = vld [vmem:[#allocation5 + $0x398] sm:$0xff]  ;;  %v321_v36 = vld [vmem:[#allocation5 + $0x3a0] sm:$0xff] }
  0x6e   :  { %977 = vmatprep.subr.bf16.mxu0 %v976_v18  ;;  %v299_v18 = vld [vmem:[#allocation5 + $0x2f0] sm:$0xff]  ;;  %v324_v32 = vld [vmem:[#allocation5 + $0x3b8] sm:$0xff]  ;;  %v950_v38 = vpack.c.bf16 %v321_v36, %v317_v35  ;;  %v603_v25 = vld [vmem:[#allocation7 + $0x220] sm:$0xff] }
  0x6f   :  { %v1002_v21 = vpack.c.bf16 %v299_v18, %v295_v17  ;;  %v1012_v34 = vpack.c.bf16 %v324_v32, %v320_v31  ;;  %v328_v43 = vld [vmem:[#allocation5 + $0x3d8] sm:$0xff]  ;;  %v331_v51 = vld [vmem:[#allocation5 + $0x3f0] sm:$0xff]  ;;  %v539_v18 = vld [vmem:[#allocation7 + $0x20] sm:$0xff] }
  0x70   :  { %939 = vmatpush1.bf16.msra.mxu1 %v938_v46  ;;  %v332_v45 = vld [vmem:[#allocation5 + $0x3f8] sm:$0xff]  ;;  %v325_v46 = vld [vmem:[#allocation5 + $0x3c0] sm:$0xff]  ;;  %v1018_v52 = vpack.c.bf16 %v331_v51, %v327_v50  ;;  %v537_v4 = vld [vmem:[#allocation7 + $0x10] sm:$0xff] }
  0x71   :  { %979 = vmatpush1.bf16.msra.mxu0 %v978_v29  ;;  %941 = vmatprep.subr.bf16.mxu1 %v940_v48  ;;  %v311_v29 = vld [vmem:[#allocation5 + $0x350] sm:$0xff]  ;;  %v1016_v48 = vpack.c.bf16 %v332_v45, %v328_v43  ;;  %v954_v49 = vpack.c.bf16 %v329_v47, %v325_v46  ;;  %v602_v56 = vld [vmem:[#allocation7 + $0x218] sm:$0xff]  ;;  %v543_v35 = vld [vmem:[#allocation7 + $0x40] sm:$0xff] }
  0x72   :  { %981 = vmatprep.subr.bf16.mxu0 %v980_v30  ;;  %v315_v30 = vld [vmem:[#allocation5 + $0x370] sm:$0xff]  ;;  %v112_v61 = vld [vmem:[%s1378_s2] sm:$0x3] }
  0x73   :  { %v1010_v33 = vpack.c.bf16 %v315_v30, %v311_v29  ;;  %v542_v11 = vld [vmem:[#allocation7 + $0x38] sm:$0xff]  ;;  %v541_v19 = vld [vmem:[#allocation7 + $0x30] sm:$0xff]  ;;  %v608_v30 = vld [vmem:[#allocation7 + $0x248] sm:$0xff] }
  0x74   :  { %943 = vmatpush1.bf16.msra.mxu1 %v942_v57  ;;  %v1084_v57 = vpack.c.bf16 %v602_v56, %v600_v55  ;;  %v606_v13 = vld [vmem:[#allocation7 + $0x238] sm:$0xff]  ;;  %v605_v26 = vld [vmem:[#allocation7 + $0x230] sm:$0xff]  ;;  %v616_v55 = vld [vmem:[#allocation7 + $0x288] sm:$0xff] }
  0x75   :  { %983 = vmatpush1.bf16.msra.mxu0 %v982_v41  ;;  %945 = vmatprep.subr.bf16.mxu1 %v944_v59  ;;  %v326_v41 = vld [vmem:[#allocation5 + $0x3c8] sm:$0xff]  ;;  %v115_v59 = vshrl.u32 %v114_v58, 7  ;;  %v1088_v24 = vpack.c.bf16 %v606_v13, %v604_v12  ;;  %v546_v29 = vld [vmem:[#allocation7 + $0x58] sm:$0xff]  ;;  %v545_v36 = vld [vmem:[#allocation7 + $0x50] sm:$0xff] }
  0x76   :  { %985 = vmatprep.subr.bf16.mxu0 %v984_v42  ;;  %v330_v42 = vld [vmem:[#allocation5 + $0x3e8] sm:$0xff]  ;;  %v610_v31 = vld [vmem:[#allocation7 + $0x258] sm:$0xff]  ;;  %v1030_v46 = vpack.c.bf16 %v545_v36, %v543_v35  ;;  %v565_v35 = vld [vmem:[#allocation7 + $0xf0] sm:$0xff] }
  0x77   :  { %v952_v44 = vpack.c.bf16 %v330_v42, %v326_v41  ;;  %v1344_v60 = vsub.s32 0, %v115_v59  ;;  %v1349_v62 = vsub.s32 1, %v115_v59  ;;  %v1092_v39 = vpack.c.bf16 %v610_v31, %v608_v30  ;;  %v609_v41 = vld [vmem:[#allocation7 + $0x250] sm:$0xff]  ;;  %v548_v42 = vld [vmem:[#allocation7 + $0x68] sm:$0xff]  ;;  %v550_v43 = vld [vmem:[#allocation7 + $0x78] sm:$0xff] }
  0x78   :  { %947 = vmatpush1.bf16.msra.mxu1 %v946_v5  ;;  %v614_v45 = vld [vmem:[#allocation7 + $0x278] sm:$0xff]  ;;  %v1032_v50 = vpack.c.bf16 %v550_v43, %v548_v42  ;;  %v551_v59 = vld [vmem:[#allocation7 + $0x80] sm:$0xff]  ;;  %v628_v30 = vld [vmem:[#allocation7 + $0x2e8] sm:$0xff] }
  0x79   :  { %987 = vmatpush1.bf16.msra.mxu0 %v986_v53  ;;  %949 = vmatprep.subr.bf16.mxu1 %v948_v8  ;;  %v536_v53 = vld [vmem:[#allocation7 + $0x8] sm:$0xff]  ;;  %v117_v63 = vrot.slane %v112_v61, %v1344_v60  ;;  %v601_v8 = vld [vmem:[#allocation7 + $0x210] sm:$0xff]  ;;  %v618_v56 = vld [vmem:[#allocation7 + $0x298] sm:$0xff] }
  0x7a   :  { %989 = vmatprep.subr.bf16.mxu0 %v988_v54  ;;  %v538_v54 = vld [vmem:[#allocation7 + $0x18] sm:$0xff]  ;;  %v1086_v17 = vpack.c.bf16 %v601_v8, %v599_v7  ;;  %v632_v42 = vld [vmem:[#allocation7 + $0x308] sm:$0xff] }
  0x7b   :  { %v1020_v1 = vpack.c.bf16 %v538_v54, %v536_v53  ;;  %v613_v53 = vld [vmem:[#allocation7 + $0x270] sm:$0xff]  ;;  %v552_v54 = vld [vmem:[#allocation7 + $0x88] sm:$0xff]  ;;  %v622_v7 = vld [vmem:[#allocation7 + $0x2b8] sm:$0xff] }
  0x7c   :  { %951 = vmatpush1.bf16.msra.mxu1 %v950_v38  ;;  %v630_v31 = vld [vmem:[#allocation7 + $0x2f8] sm:$0xff] }
  0x7d   :  { %991 = vmatpush1.bf16.msra.mxu0 %v990_v0  ;;  %953 = vmatprep.subr.bf16.mxu1 %v952_v44  ;;  %v121_v0 = vrot.slane %v112_v61, %v1349_v62  ;;  %v612_v44 = vld [vmem:[#allocation7 + $0x268] sm:$0xff]  ;;  %v553_v61 = vld [vmem:[#allocation7 + $0x90] sm:$0xff]  ;;  %v634_v43 = vld [vmem:[#allocation7 + $0x318] sm:$0xff] }
  0x7e   :  { %993 = vmatprep.subr.bf16.mxu0 %v992_v2  ;;  %v1096_v51 = vpack.c.bf16 %v614_v45, %v612_v44  ;;  %v1038_v8 = vpack.c.bf16 %v553_v61, %v551_v59 }
  0x80   :  { %955 = vmatpush1.bf16.msra.mxu1 %v954_v49  ;;  %v549_v49 = vld [vmem:[#allocation7 + $0x70] sm:$0xff] }
  0x81   :  { %995 = vmatpush1.bf16.msra.mxu0 %v994_v9  ;;  %1085 = vmatprep.subr.bf16.mxu1 %v1084_v57  ;;  %v540_v9 = vld [vmem:[#allocation7 + $0x28] sm:$0xff] }
  0x82   :  { %997 = vmatprep.subr.bf16.mxu0 %v996_v10  ;;  %v1024_v23 = vpack.c.bf16 %v542_v11, %v540_v9  ;;  %v557_v11 = vld [vmem:[#allocation7 + $0xb0] sm:$0xff] }
  0x85   :  { %999 = vmatpush1.bf16.msra.mxu0 %v998_v15 }
  0x86   :  { %1001 = vmatprep.subr.bf16.mxu0 %v1000_v16  ;;  %v1022_v16 = vpack.c.bf16 %v537_v4, %v535_v3  ;;  %v617_v3 = vld [vmem:[#allocation7 + $0x290] sm:$0xff]  ;;  %v556_v4 = vld [vmem:[#allocation7 + $0xa8] sm:$0xff] }
  0x89   :  { %1003 = vmatpush1.bf16.msra.mxu0 %v1002_v21 }
  0x8a   :  { %1005 = vmatprep.subr.bf16.mxu0 %v1004_v22 }
  0x8d   :  { %1007 = vmatpush1.bf16.msra.mxu0 %v1006_v27  ;;  %v544_v27 = vld [vmem:[#allocation7 + $0x48] sm:$0xff] }
  0x8e   :  { %1009 = vmatprep.subr.bf16.mxu0 %v1008_v28  ;;  %v1028_v38 = vpack.c.bf16 %v546_v29, %v544_v27  ;;  %v625_v27 = vld [vmem:[#allocation7 + $0x2d0] sm:$0xff]  ;;  %v566_v29 = vld [vmem:[#allocation7 + $0xf8] sm:$0xff] }
  0x91   :  { %1011 = vmatpush1.bf16.msra.mxu0 %v1010_v33  ;;  %v1026_v33 = vpack.c.bf16 %v541_v19, %v539_v18  ;;  %v624_v18 = vld [vmem:[#allocation7 + $0x2c8] sm:$0xff]  ;;  %v626_v19 = vld [vmem:[#allocation7 + $0x2d8] sm:$0xff] }
  0x92   :  { %1013 = vmatprep.subr.bf16.mxu0 %v1012_v34  ;;  %v1090_v34 = vpack.c.bf16 %v605_v26, %v603_v25  ;;  %v1108_v25 = vpack.c.bf16 %v626_v19, %v624_v18  ;;  %v623_v26 = vld [vmem:[#allocation7 + $0x2c0] sm:$0xff] }
  0x95   :  { %1015 = vmatpush1.bf16.msra.mxu0 %v1014_v40  ;;  %v607_v40 = vld [vmem:[#allocation7 + $0x240] sm:$0xff] }
  0x96   :  { %1017 = vmatprep.subr.bf16.mxu0 %v1016_v48  ;;  %v1094_v47 = vpack.c.bf16 %v609_v41, %v607_v40  ;;  %v547_v48 = vld [vmem:[#allocation7 + $0x60] sm:$0xff]  ;;  %v568_v40 = vld [vmem:[#allocation7 + $0x108] sm:$0xff]  ;;  %v570_v41 = vld [vmem:[#allocation7 + $0x118] sm:$0xff] }
  0x97   :  { %v1034_v57 = vpack.c.bf16 %v549_v49, %v547_v48  ;;  %v1052_v48 = vpack.c.bf16 %v570_v41, %v568_v40  ;;  %v1116_v49 = vpack.c.bf16 %v634_v43, %v632_v42  ;;  %v588_v40 = vld [vmem:[#allocation7 + $0x1a8] sm:$0xff]  ;;  %v590_v41 = vld [vmem:[#allocation7 + $0x1b8] sm:$0xff]  ;;  %v587_v43 = vld [vmem:[#allocation7 + $0x1a0] sm:$0xff] }
  0x98   :  { %v1072_v42 = vpack.c.bf16 %v590_v41, %v588_v40 }
  0x99   :  { %1019 = vmatpush1.bf16.msra.mxu0 %v1018_v52  ;;  %v611_v52 = vld [vmem:[#allocation7 + $0x260] sm:$0xff] }
  0x9a   :  { %1021 = vmatprep.subr.bf16.mxu0 %v1020_v1  ;;  %v554_v1 = vld [vmem:[#allocation7 + $0x98] sm:$0xff]  ;;  %v1098_v58 = vpack.c.bf16 %v613_v53, %v611_v52  ;;  %v572_v52 = vld [vmem:[#allocation7 + $0x128] sm:$0xff] }
  0x9b   :  { %v574_v53 = vld [vmem:[#allocation7 + $0x138] sm:$0xff] }
  0x9c   :  { %v1056_v59 = vpack.c.bf16 %v574_v53, %v572_v52  ;;  %v592_v52 = vld [vmem:[#allocation7 + $0x1c8] sm:$0xff]  ;;  %v594_v53 = vld [vmem:[#allocation7 + $0x1d8] sm:$0xff] }
 0x12f   :  { %v190_v2 = vpop.f32.mrb[0].mxu0 }
 0x130   :  { %v191_v5 = vadd.f32 %v190_v2, %v117_v63  ;;  %v192_v6 = vpop.f32.mrb[1].mxu0  ;;  %v615_v2 = vld [vmem:[#allocation7 + $0x280] sm:$0xff] }
 0x131   :  { %v193_v10 = vadd.f32 %v192_v6, %v121_v0  ;;  %v620_v6 = vld [vmem:[#allocation7 + $0x2a8] sm:$0xff]  ;;  %v1102_v9 = vpack.c.bf16 %v617_v3, %v615_v2  ;;  %v578_v3 = vld [vmem:[#allocation7 + $0x158] sm:$0xff] }
 0x132   :  { %v201_v20 = vmax.f32 %v191_v5, 0.0  ;;  %v558_v5 = vld [vmem:[#allocation7 + $0xb8] sm:$0xff]  ;;  %v1104_v13 = vpack.c.bf16 %v622_v7, %v620_v6  ;;  %v576_v2 = vld [vmem:[#allocation7 + $0x148] sm:$0xff] }
 0x133   :  { %v202_v14 = vmax.f32 %v193_v10, 0.0  ;;  %v196_v15 = vpop.f32.mrb[2].mxu0  ;;  %v555_v10 = vld [vmem:[#allocation7 + $0xa0] sm:$0xff]  ;;  %v1040_v12 = vpack.c.bf16 %v558_v5, %v556_v4  ;;  %v640_v4 = vld [vmem:[#allocation7 + $0x348] sm:$0xff]  ;;  %v642_v5 = vld [vmem:[#allocation7 + $0x358] sm:$0xff] }
 0x134   :  { %v197_v21 = vadd.f32 %v196_v15, %v117_v63  ;;  %v198_v22 = vpop.f32.mrb[3].mxu0  ;;  %v1036_v63 = vpack.c.bf16 %v554_v1, %v552_v54  ;;  %v621_v15 = vld [vmem:[#allocation7 + $0x2b0] sm:$0xff]  ;;  %v636_v54 = vld [vmem:[#allocation7 + $0x328] sm:$0xff]  ;;  %v638_v1 = vld [vmem:[#allocation7 + $0x338] sm:$0xff] }
 0x135   :  { %v199_v28 = vadd.f32 %v198_v22, %v121_v0  ;;  %397 = vmatprep.mubr.f32.mxu1 %v202_v14  ;;  %474 = vmatprep.mubr.f32.mxu0 %v202_v14  ;;  %v1100_v0 = vpack.c.bf16 %v618_v56, %v616_v55  ;;  %v619_v14 = vld [vmem:[#allocation7 + $0x2a0] sm:$0xff]  ;;  %v1120_v61 = vpack.c.bf16 %v638_v1, %v636_v54 }
 0x136   :  { %398 = vmatmul.mubr.f32.vlgmr.msra.gmra.mrb[0].mxu1 %v201_v20  ;;  %475 = vmatmul.mubr.f32.vlgmr.msra.gmra.mrb[4].mxu0 %v201_v20  ;;  %v203_v37 = vmax.f32 %v197_v21, 0.0  ;;  %v1042_v20 = vpack.c.bf16 %v557_v11, %v555_v10  ;;  %v1106_v21 = vpack.c.bf16 %v621_v15, %v619_v14  ;;  %v559_v22 = vld [vmem:[#allocation7 + $0xc0] sm:$0xff]  ;;  %v1060_v10 = vpack.c.bf16 %v578_v3, %v576_v2  ;;  %v580_v14 = vld [vmem:[#allocation7 + $0x168] sm:$0xff]  ;;  %v582_v15 = vld [vmem:[#allocation7 + $0x178] sm:$0xff] }
 0x137   :  { %v204_v32 = vmax.f32 %v199_v28, 0.0  ;;  %1023 = vmatpush1.bf16.msra.mxu0 %v1022_v16  ;;  %1087 = vmatpush1.bf16.msra.mxu1 %v1086_v17  ;;  %v560_v16 = vld [vmem:[#allocation7 + $0xc8] sm:$0xff]  ;;  %v562_v17 = vld [vmem:[#allocation7 + $0xd8] sm:$0xff]  ;;  %v1124_v11 = vpack.c.bf16 %v642_v5, %v640_v4  ;;  %v1076_v54 = vpack.c.bf16 %v594_v53, %v592_v52  ;;  %v591_v1 = vld [vmem:[#allocation7 + $0x1c0] sm:$0xff] }
 0x138   :  { %1025 = vmatprep.subr.bf16.mxu0 %v1024_v23  ;;  %1089 = vmatprep.subr.bf16.mxu1 %v1088_v24  ;;  %v561_v23 = vld [vmem:[#allocation7 + $0xd0] sm:$0xff]  ;;  %v1044_v24 = vpack.c.bf16 %v562_v17, %v560_v16  ;;  %v564_v28 = vld [vmem:[#allocation7 + $0xe8] sm:$0xff]  ;;  %v646_v17 = vld [vmem:[#allocation7 + $0x378] sm:$0xff] }
 0x139   :  { %403 = vmatprep.mubr.f32.mxu1 %v204_v32  ;;  %480 = vmatprep.mubr.f32.mxu0 %v204_v32  ;;  %v1046_v32 = vpack.c.bf16 %v561_v23, %v559_v22  ;;  %v1048_v36 = vpack.c.bf16 %v566_v29, %v564_v28  ;;  %v644_v16 = vld [vmem:[#allocation7 + $0x368] sm:$0xff]  ;;  %v581_v22 = vld [vmem:[#allocation7 + $0x170] sm:$0xff]  ;;  %v598_v3 = vld [vmem:[#allocation7 + $0x1f8] sm:$0xff] }
 0x13a   :  { %404 = vmatmul.mubr.f32.gmra.mrb[2].mxu1 %v203_v37  ;;  %481 = vmatmul.mubr.f32.gmra.mrb[6].mxu0 %v203_v37  ;;  %v1112_v37 = vpack.c.bf16 %v630_v31, %v628_v30  ;;  %v1128_v23 = vpack.c.bf16 %v646_v17, %v644_v16  ;;  %v583_v31 = vld [vmem:[#allocation7 + $0x180] sm:$0xff]  ;;  %v596_v2 = vld [vmem:[#allocation7 + $0x1e8] sm:$0xff] }
 0x13b   :  { %1027 = vmatpush1.bf16.msra.mxu0 %v1026_v33  ;;  %1091 = vmatpush1.bf16.msra.mxu1 %v1090_v34  ;;  %v1110_v33 = vpack.c.bf16 %v625_v27, %v623_v26  ;;  %v563_v34 = vld [vmem:[#allocation7 + $0xe0] sm:$0xff]  ;;  %v584_v26 = vld [vmem:[#allocation7 + $0x188] sm:$0xff]  ;;  %v586_v27 = vld [vmem:[#allocation7 + $0x198] sm:$0xff]  ;;  %v1080_v4 = vpack.c.bf16 %v598_v3, %v596_v2 }
 0x13c   :  { %1029 = vmatprep.subr.bf16.mxu0 %v1028_v38  ;;  %1093 = vmatprep.subr.bf16.mxu1 %v1092_v39  ;;  %v627_v38 = vld [vmem:[#allocation7 + $0x2e0] sm:$0xff]  ;;  %v629_v39 = vld [vmem:[#allocation7 + $0x2f0] sm:$0xff]  ;;  %v1050_v44 = vpack.c.bf16 %v565_v35, %v563_v34  ;;  %v1068_v30 = vpack.c.bf16 %v586_v27, %v584_v26  ;;  %v648_v34 = vld [vmem:[#allocation7 + $0x388] sm:$0xff] }
 0x13d   :  { %v1114_v45 = vpack.c.bf16 %v629_v39, %v627_v38  ;;  %v650_v35 = vld [vmem:[#allocation7 + $0x398] sm:$0xff]  ;;  %v649_v38 = vld [vmem:[#allocation7 + $0x390] sm:$0xff]  ;;  %v595_v5 = vld [vmem:[#allocation7 + $0x1e0] sm:$0xff] }
 0x13e   :  { %v509_v17 = vld [vmem:[%s1381_s5] sm:$0x3] }
 0x13f   :  { %1031 = vmatpush1.bf16.msra.mxu0 %v1030_v46  ;;  %1095 = vmatpush1.bf16.msra.mxu1 %v1094_v47  ;;  %v567_v46 = vld [vmem:[#allocation7 + $0x100] sm:$0xff]  ;;  %v569_v47 = vld [vmem:[#allocation7 + $0x110] sm:$0xff] }
 0x140   :  { %1033 = vmatprep.subr.bf16.mxu0 %v1032_v50  ;;  %1097 = vmatprep.subr.bf16.mxu1 %v1096_v51  ;;  %v631_v50 = vld [vmem:[#allocation7 + $0x300] sm:$0xff]  ;;  %v633_v51 = vld [vmem:[#allocation7 + $0x310] sm:$0xff]  ;;  %v1054_v55 = vpack.c.bf16 %v569_v47, %v567_v46  ;;  %v652_v46 = vld [vmem:[#allocation7 + $0x3a8] sm:$0xff] }
 0x141   :  { %v1118_v56 = vpack.c.bf16 %v633_v51, %v631_v50  ;;  %v654_v47 = vld [vmem:[#allocation7 + $0x3b8] sm:$0xff]  ;;  %v653_v50 = vld [vmem:[#allocation7 + $0x3b0] sm:$0xff] }
 0x142   :  { %v663_v52 = vld [vmem:[%s1383_s7] sm:$0x3] }
 0x143   :  { %1035 = vmatpush1.bf16.msra.mxu0 %v1034_v57  ;;  %1099 = vmatpush1.bf16.msra.mxu1 %v1098_v58  ;;  %v571_v57 = vld [vmem:[#allocation7 + $0x120] sm:$0xff]  ;;  %v573_v58 = vld [vmem:[#allocation7 + $0x130] sm:$0xff]  ;;  %v668_v53 = vrot.slane %v663_v52, %v1344_v60 }
 0x144   :  { %1037 = vmatprep.subr.bf16.mxu0 %v1036_v63  ;;  %1101 = vmatprep.subr.bf16.mxu1 %v1100_v0  ;;  %v635_v63 = vld [vmem:[#allocation7 + $0x320] sm:$0xff]  ;;  %v637_v0 = vld [vmem:[#allocation7 + $0x330] sm:$0xff]  ;;  %v1058_v6 = vpack.c.bf16 %v573_v58, %v571_v57  ;;  %v656_v57 = vld [vmem:[#allocation7 + $0x3c8] sm:$0xff] }
 0x145   :  { %v1122_v7 = vpack.c.bf16 %v637_v0, %v635_v63  ;;  %v658_v58 = vld [vmem:[#allocation7 + $0x3d8] sm:$0xff]  ;;  %v657_v63 = vld [vmem:[#allocation7 + $0x3d0] sm:$0xff] }
 0x147   :  { %1039 = vmatpush1.bf16.msra.mxu0 %v1038_v8  ;;  %1103 = vmatpush1.bf16.msra.mxu1 %v1102_v9  ;;  %v575_v8 = vld [vmem:[#allocation7 + $0x140] sm:$0xff]  ;;  %v577_v9 = vld [vmem:[#allocation7 + $0x150] sm:$0xff] }
 0x148   :  { %1041 = vmatprep.subr.bf16.mxu0 %v1040_v12  ;;  %1105 = vmatprep.subr.bf16.mxu1 %v1104_v13  ;;  %v639_v12 = vld [vmem:[#allocation7 + $0x340] sm:$0xff]  ;;  %v641_v13 = vld [vmem:[#allocation7 + $0x350] sm:$0xff]  ;;  %v1062_v18 = vpack.c.bf16 %v577_v9, %v575_v8  ;;  %v660_v8 = vld [vmem:[#allocation7 + $0x3e8] sm:$0xff] }
 0x149   :  { %v1126_v19 = vpack.c.bf16 %v641_v13, %v639_v12  ;;  %v662_v9 = vld [vmem:[#allocation7 + $0x3f8] sm:$0xff]  ;;  %v661_v12 = vld [vmem:[#allocation7 + $0x3f0] sm:$0xff] }
 0x14b   :  { %1043 = vmatpush1.bf16.msra.mxu0 %v1042_v20  ;;  %1107 = vmatpush1.bf16.msra.mxu1 %v1106_v21  ;;  %v579_v20 = vld [vmem:[#allocation7 + $0x160] sm:$0xff]  ;;  %v1064_v21 = vpack.c.bf16 %v582_v15, %v580_v14 }
 0x14c   :  { %1045 = vmatprep.subr.bf16.mxu0 %v1044_v24  ;;  %1109 = vmatprep.subr.bf16.mxu1 %v1108_v25  ;;  %v643_v24 = vld [vmem:[#allocation7 + $0x360] sm:$0xff]  ;;  %v645_v25 = vld [vmem:[#allocation7 + $0x370] sm:$0xff]  ;;  %v1066_v28 = vpack.c.bf16 %v581_v22, %v579_v20  ;;  %v514_v22 = vrot.slane %v509_v17, %v1344_v60 }
 0x14d   :  { %v1130_v29 = vpack.c.bf16 %v645_v25, %v643_v24  ;;  %v487_v14 = vld [vmem:[%s1380_s4] sm:$0x3]  ;;  %v518_v25 = vrot.slane %v509_v17, %v1349_v62 }
 0x14f   :  { %1047 = vmatpush1.bf16.msra.mxu0 %v1046_v32  ;;  %1111 = vmatpush1.bf16.msra.mxu1 %v1110_v33  ;;  %v585_v32 = vld [vmem:[#allocation7 + $0x190] sm:$0xff] }
 0x150   :  { %1049 = vmatprep.subr.bf16.mxu0 %v1048_v36  ;;  %1113 = vmatprep.subr.bf16.mxu1 %v1112_v37  ;;  %v1070_v33 = vpack.c.bf16 %v585_v32, %v583_v31  ;;  %v1132_v36 = vpack.c.bf16 %v650_v35, %v648_v34  ;;  %v647_v37 = vld [vmem:[#allocation7 + $0x380] sm:$0xff] }
 0x151   :  { %v1134_v39 = vpack.c.bf16 %v649_v38, %v647_v37 }
 0x153   :  { %1051 = vmatpush1.bf16.msra.mxu0 %v1050_v44  ;;  %1115 = vmatpush1.bf16.msra.mxu1 %v1114_v45  ;;  %v589_v44 = vld [vmem:[#allocation7 + $0x1b0] sm:$0xff] }
 0x154   :  { %1053 = vmatprep.subr.bf16.mxu0 %v1052_v48  ;;  %1117 = vmatprep.subr.bf16.mxu1 %v1116_v49  ;;  %v1074_v45 = vpack.c.bf16 %v589_v44, %v587_v43  ;;  %v1136_v48 = vpack.c.bf16 %v654_v47, %v652_v46  ;;  %v651_v49 = vld [vmem:[#allocation7 + $0x3a0] sm:$0xff] }
 0x155   :  { %v1138_v51 = vpack.c.bf16 %v653_v50, %v651_v49 }
 0x157   :  { %1055 = vmatpush1.bf16.msra.mxu0 %v1054_v55  ;;  %1119 = vmatpush1.bf16.msra.mxu1 %v1118_v56  ;;  %v593_v55 = vld [vmem:[#allocation7 + $0x1d0] sm:$0xff] }
 0x158   :  { %1057 = vmatprep.subr.bf16.mxu0 %v1056_v59  ;;  %1121 = vmatprep.subr.bf16.mxu1 %v1120_v61  ;;  %v1078_v56 = vpack.c.bf16 %v593_v55, %v591_v1  ;;  %v1140_v59 = vpack.c.bf16 %v658_v58, %v656_v57  ;;  %v655_v61 = vld [vmem:[#allocation7 + $0x3c0] sm:$0xff] }
 0x159   :  { %v1142_v0 = vpack.c.bf16 %v657_v63, %v655_v61  ;;  %v819_v55 = vld [vmem:[%s1384_s8] sm:$0x3] }
 0x15a   :  { %v828_v3 = vrot.slane %v819_v55, %v1349_v62 }
 0x15b   :  { %1059 = vmatpush1.bf16.msra.mxu0 %v1058_v6  ;;  %1123 = vmatpush1.bf16.msra.mxu1 %v1122_v7  ;;  %v597_v6 = vld [vmem:[#allocation7 + $0x1f0] sm:$0xff] }
 0x15c   :  { %1061 = vmatprep.subr.bf16.mxu0 %v1060_v10  ;;  %1125 = vmatprep.subr.bf16.mxu1 %v1124_v11  ;;  %v1082_v7 = vpack.c.bf16 %v597_v6, %v595_v5  ;;  %v1144_v10 = vpack.c.bf16 %v662_v9, %v660_v8  ;;  %v659_v11 = vld [vmem:[#allocation7 + $0x3e0] sm:$0xff]  ;;  %v858_v9 = vld [vmem:[#allocation2] ss:$0 sm:$0xff] }
 0x15d   :  { %v1146_v13 = vpack.c.bf16 %v661_v12, %v659_v11 }
 0x15f   :  { %1063 = vmatpush1.bf16.msra.mxu0 %v1062_v18  ;;  %1127 = vmatpush1.bf16.msra.mxu1 %v1126_v19  ;;  %v492_v18 = vrot.slane %v487_v14, %v1344_v60 }
 0x160   :  { %1065 = vmatprep.subr.bf16.mxu0 %v1064_v21  ;;  %1129 = vmatprep.subr.bf16.mxu1 %v1128_v23  ;;  %v496_v21 = vrot.slane %v487_v14, %v1349_v62 }
 0x163   :  { %1067 = vmatpush1.bf16.msra.mxu0 %v1066_v28  ;;  %1131 = vmatpush1.bf16.msra.mxu1 %v1130_v29 }
 0x164   :  { %1069 = vmatprep.subr.bf16.mxu0 %v1068_v30  ;;  %1133 = vmatprep.subr.bf16.mxu1 %v1132_v36 }
 0x167   :  { %1071 = vmatpush1.bf16.msra.mxu0 %v1070_v33  ;;  %1135 = vmatpush1.bf16.msra.mxu1 %v1134_v39 }
 0x168   :  { %1073 = vmatprep.subr.bf16.mxu0 %v1072_v42  ;;  %1137 = vmatprep.subr.bf16.mxu1 %v1136_v48 }
 0x16b   :  { %1075 = vmatpush1.bf16.msra.mxu0 %v1074_v45  ;;  %1139 = vmatpush1.bf16.msra.mxu1 %v1138_v51 }
 0x16c   :  { %1077 = vmatprep.subr.bf16.mxu0 %v1076_v54  ;;  %1141 = vmatprep.subr.bf16.mxu1 %v1140_v59  ;;  %v672_v54 = vrot.slane %v663_v52, %v1349_v62 }
 0x16f   :  { %1079 = vmatpush1.bf16.msra.mxu0 %v1078_v56  ;;  %1143 = vmatpush1.bf16.msra.mxu1 %v1142_v0  ;;  %v824_v0 = vrot.slane %v819_v55, %v1344_v60 }
 0x170   :  { %1081 = vmatprep.subr.bf16.mxu0 %v1080_v4  ;;  %1145 = vmatprep.subr.bf16.mxu1 %v1144_v10 }
 0x173   :  { %1083 = vmatpush1.bf16.msra.mxu0 %v1082_v7  ;;  %1147 = vmatpush1.bf16.msra.mxu1 %v1146_v13 }
 0x209   :  { %v399_v15 = vpop.f32.mrb[0].mxu1  ;;  %v476_v16 = vpop.f32.mrb[4].mxu0 }
 0x20a   :  { %v401_v19 = vpop.f32.mrb[1].mxu1  ;;  %v478_v20 = vpop.f32.mrb[5].mxu0  ;;  %v499_v26 = vadd.f32 %v492_v18, %v399_v15 }
 0x20b   :  { %v500_v30 = vadd.f32 %v496_v21, %v401_v19 }
 0x20c   :  { %v503_v38 = vmax.f32 %v499_v26, 0.0 }
 0x20d   :  { %v405_v23 = vpop.f32.mrb[2].mxu1  ;;  %v482_v24 = vpop.f32.mrb[6].mxu0  ;;  %v504_v41 = vmax.f32 %v500_v30, 0.0 }
 0x20e   :  { %v507_v27 = vsub.f32 %v476_v16, %v482_v24  ;;  %v407_v28 = vpop.f32.mrb[3].mxu1  ;;  %v484_v29 = vpop.f32.mrb[7].mxu0  ;;  %v501_v32 = vadd.f32 %v492_v18, %v405_v23 }
 0x20f   :  { %v508_v31 = vsub.f32 %v478_v20, %v484_v29  ;;  %v502_v35 = vadd.f32 %v496_v21, %v407_v28 }
 0x210   :  { %v521_v33 = vadd.f32 %v514_v22, %v507_v27  ;;  %v525_v34 = vsub.f32 0.0, %v507_v27  ;;  %v505_v44 = vmax.f32 %v501_v32, 0.0 }
 0x211   :  { %v522_v36 = vadd.f32 %v518_v25, %v508_v31  ;;  %v526_v37 = vsub.f32 0.0, %v508_v31  ;;  %v506_v47 = vmax.f32 %v502_v35, 0.0 }
 0x212   :  { %v523_v39 = vmax.f32 %v521_v33, 0.0  ;;  %v527_v40 = vadd.f32 %v525_v34, %v514_v22 }
 0x213   :  { %v524_v42 = vmax.f32 %v522_v36, 0.0  ;;  %v528_v43 = vadd.f32 %v526_v37, %v518_v25 }
 0x214   :  { %v529_v45 = vmax.f32 %v527_v40, 0.0  ;;  %v531_v46 = vadd.f32 %v523_v39, %v503_v38 }
 0x215   :  { %v530_v48 = vmax.f32 %v528_v43, 0.0  ;;  %v532_v49 = vadd.f32 %v524_v42, %v504_v41 }
 0x216   :  { %v533_v50 = vadd.f32 %v529_v45, %v505_v44 }
 0x217   :  { %739 = vmatprep.mubr.f32.mxu0 %v532_v49  ;;  %v534_v51 = vadd.f32 %v530_v48, %v506_v47 }
 0x218   :  { %740 = vmatmul.mubr.f32.vlgmr.msra.gmra.mrb[8].mxu0 %v531_v46 }
 0x219   :  { %810 = vmatprep.mubr.f32.mxu1 %v534_v51 }
 0x21a   :  { %811 = vmatmul.mubr.f32.vlgmr.msra.gmra.mrb[4].mxu1 %v533_v50 }
 0x2eb   :  { %v741_v1 = vpop.f32.mrb[8].mxu0 }
 0x2ec   :  { %v742_v56 = vadd.f32 %v741_v1, %v668_v53  ;;  %v743_v57 = vpop.f32.mrb[9].mxu0 }
 0x2ed   :  { %v744_v58 = vadd.f32 %v743_v57, %v672_v54  ;;  %v812_v59 = vpop.f32.mrb[4].mxu1 }
 0x2ee   :  { %v813_v61 = vadd.f32 %v812_v59, %v742_v56  ;;  %v814_v63 = vpop.f32.mrb[5].mxu1 }
 0x2ef   :  { %v815_v2 = vadd.f32 %v814_v63, %v744_v58 }
 0x2f0   :  { %v817_v4 = vmax.f32 %v813_v61, 0.0 }
 0x2f1   :  { %v818_v5 = vmax.f32 %v815_v2, 0.0 }
 0x2f2   :  { %v831_v6 = vmul.f32 %v824_v0, %v817_v4 }
 0x2f3   :  { %v832_v7 = vmul.f32 %v828_v3, %v818_v5 }
 0x2f5   :  { %v833_v8 = vadd.f32 %v832_v7, %v831_v6 }
 0x2f7   :  { %834 = vadd.xlane.f32.xlu0 %v833_v8 }
 0x384   :  { %v835_v10 = vpop.xlane.xlu0 %834 }
 0x385   :  { %v843_v11 = vadd.f32 %v858_v9, %v835_v10 }
 0x387   :  { %v859_v12 = vmul.f32 -1.442695, %v843_v11 }
 0x389   :  { %1160 = vpow2.f32 %v859_v12 }
 0x393   :  { %v1161_v13 = vpop.eup %1160 }
 0x394   :  { %v847_v14 = vadd.f32 1.0, %v1161_v13 }
 0x396   :  { %1162 = vrcp.f32 %v847_v14 }
 0x3a0   :  { %v1163_v15 = vpop.eup %1162 }
 0x3a1   :  { %851 = vst.msk [vmem:[%s1386_s10] sm:$0xff] %vm850_vm0, %v1163_v15 }
 0x3a2   :  { %856 = vsyncpa [#allocation4], 1 }
 0x3a3   :  { %857 = vsyncpa [#allocation6], 1 }

</bundles_post_ra>
